<compile_context>
chip_gen: v7x
topology: tpu7x:2x2x1
jax: 0.10.0
libtpu: 0.0.40
codegen_flags: <defaults>
</compile_context>

<pallas_src>
import functools

import jax
import jax.numpy as jnp
from jax import lax
from jax.experimental import pallas as pl
from jax.experimental.pallas import tpu as pltpu

BN_EPS = 1e-5


# ----------------------------- Pallas kernels ------------------------------ #

def _stats_kernel(patches_ref, w_ref, sum_ref, sumsq_ref, acc_sum, acc_sq):
    """Pass 1: accumulate per-channel sum and sum-of-squares of y = P @ W."""
    i = pl.program_id(0)

    @pl.when(i == 0)
    def _init():
        acc_sum[...] = jnp.zeros_like(acc_sum)
        acc_sq[...] = jnp.zeros_like(acc_sq)

    # (TM, K) bf16 @ (K, C_pad) bf16 -> (TM, C_pad) f32 on the MXU.
    y = jnp.dot(patches_ref[...], w_ref[...], preferred_element_type=jnp.float32)
    acc_sum[...] += jnp.sum(y, axis=0, keepdims=True)       # XLU cross-sublane reduce
    acc_sq[...] += jnp.sum(y * y, axis=0, keepdims=True)

    @pl.when(i == pl.num_programs(0) - 1)
    def _finalize():
        sum_ref[...] = acc_sum[...]
        sumsq_ref[...] = acc_sq[...]


def _normalize_kernel(patches_ref, w_ref, scale_ref, shift_ref, out_ref):
    """Pass 2: y = P @ W; out = relu(y * scale + shift) — one FMA + max per element."""
    y = jnp.dot(patches_ref[...], w_ref[...], preferred_element_type=jnp.float32)
    out_ref[...] = jnp.maximum(y * scale_ref[...] + shift_ref[...], 0.0).astype(out_ref.dtype)


# ------------------------------ Host wrapper ------------------------------- #

def _extract_patches(x, k, s, p, dtype):
    """x: (N, C, H, W) -> (N*OH*OW, C*k*k), inner order (c, ki, kj) = PyTorch OIHW order."""
    patches = lax.conv_general_dilated_patches(
        x.astype(dtype),
        filter_shape=(k, k),
        window_strides=(s, s),
        padding=((p, p), (p, p)),
        dimension_numbers=("NCHW", "OIHW", "NHWC"),   # NHWC out -> reshape is free
    )  # (N, OH, OW, C*k*k)
    n, oh, ow, kk = patches.shape
    return patches.reshape(n * oh * ow, kk), oh, ow


def conv_layer_forward(x, weight, gamma, beta, k, s, p, *,
                       tm=512, matmul_dtype=jnp.bfloat16, nchw_output=True):
    """Equivalent of ConvLayer.forward (Conv2d bias=False -> BN2d batch stats -> ReLU).

    x:      (N, in_c, H, W)   f32
    weight: (out_c, in_c, k, k) f32
    gamma, beta: (out_c,)     f32
    returns (N, out_c, OH, OW) f32   (or NHWC if nchw_output=False)
    """
    N = x.shape[0]
    out_c = weight.shape[0]

    # im2col (bf16), NHWC-flat.
    patches, OH, OW = _extract_patches(x, k, s, p, matmul_dtype)   # (M, K)
    M, K = patches.shape

    # Tile the row axis; pad rows with zeros (they contribute 0 to the BN sums).
    tm = max(8, min((tm // 8) * 8, pl.cdiv(M, 8) * 8))
    num_tiles = pl.cdiv(M, tm)
    m_pad = num_tiles * tm
    if m_pad != M:
        patches = jnp.pad(patches, ((0, m_pad - M), (0, 0)))

    # Lane-dense (128-wide) channel padding for W / gamma / beta / output.
    c_pad = pl.cdiv(out_c, 128) * 128
    w_mat = weight.reshape(out_c, K).T.astype(matmul_dtype)          # (K, out_c)
    w_pad = jnp.zeros((K, c_pad), matmul_dtype).at[:, :out_c].set(w_mat)
    gamma_pad = jnp.zeros((1, c_pad), jnp.float32).at[0, :out_c].set(gamma.astype(jnp.float32))
    beta_pad = jnp.zeros((1, c_pad), jnp.float32).at[0, :out_c].set(beta.astype(jnp.float32))

    grid = (num_tiles,)
    patches_spec = pl.BlockSpec((tm, K), lambda i: (i, 0))       # last dim == full K (allowed)
    w_spec = pl.BlockSpec((K, c_pad), lambda i: (0, 0))          # resident
    vec_spec = pl.BlockSpec((1, c_pad), lambda i: (0, 0))        # resident per-channel vectors

    # ---- Pass 1: per-channel sum / sum-of-squares over all M rows. ----
    ch_sum, ch_sumsq = pl.pallas_call(
        _stats_kernel,
        out_shape=(jax.ShapeDtypeStruct((1, c_pad), jnp.float32),
                   jax.ShapeDtypeStruct((1, c_pad), jnp.float32)),
        grid=grid,
        in_specs=[patches_spec, w_spec],
        out_specs=(vec_spec, vec_spec),
        scratch_shapes=[pltpu.VMEM((1, c_pad), jnp.float32),
                        pltpu.VMEM((1, c_pad), jnp.float32)],
        compiler_params=pltpu.CompilerParams(
            dimension_semantics=("arbitrary",)),     # reduction axis: stats accumulate
    )(patches, w_pad)

    # ---- Fold BN into a per-channel scale/shift (tiny C-sized math, plain JAX). ----
    m_count = jnp.float32(M)                          # true rows only (pad rows add 0)
    mean = ch_sum / m_count
    var = jnp.maximum(ch_sumsq / m_count - mean * mean, 0.0)   # biased 1/M, as PyTorch BN
    inv_std = lax.rsqrt(var + BN_EPS)
    scale = gamma_pad * inv_std                       # y*scale + shift == gamma*(y-mean)/std + beta
    shift = beta_pad - mean * scale

    # ---- Pass 2: normalize + ReLU (independent tiles -> 'parallel'). ----
    out_flat = pl.pallas_call(
        _normalize_kernel,
        out_shape=jax.ShapeDtypeStruct((m_pad, c_pad), jnp.float32),
        grid=grid,
        in_specs=[patches_spec, w_spec, vec_spec, vec_spec],
        out_specs=pl.BlockSpec((tm, c_pad), lambda i: (i, 0)),
        compiler_params=pltpu.CompilerParams(
            dimension_semantics=("parallel",)),       # megacore / 2-TC shardable
    )(patches, w_pad, scale, shift)

    out = out_flat[:M, :out_c].reshape(N, OH, OW, out_c)      # NHWC-flat -> NHWC
    if nchw_output:
        out = out.transpose(0, 3, 1, 2)   # match PyTorch NCHW; set False if consumer takes NHWC
    return out


if __name__ == "__main__":
    # Small shapes consistent with ConvLayer(in_c=4, out_c=8, k=3, s=1, p=1).
    N, in_c, H, W = 2, 4, 16, 16
    out_c, k, s, p = 8, 3, 1, 1

    key = jax.random.PRNGKey(0)
    kx, kw = jax.random.split(key)
    x = jax.random.normal(kx, (N, in_c, H, W), dtype=jnp.float32)
    weight = 0.1 * jax.random.normal(kw, (out_c, in_c, k, k), dtype=jnp.float32)
    gamma = jnp.ones((out_c,), dtype=jnp.float32)   # BN affine defaults
    beta = jnp.zeros((out_c,), dtype=jnp.float32)

    # tm=256 so the small demo exercises a multi-tile grid; default is 512 for real shapes.
    fwd = jax.jit(functools.partial(conv_layer_forward, k=k, s=s, p=p, tm=256))
    out = fwd(x, weight, gamma, beta)
    jax.block_until_ready(out)
    assert out.shape == (N, out_c, H, W)
    print("KERNEL_OK")
</pallas_src>

<mosaic_0001>
module attributes {stable_mosaic.version = 11 : i64} {
  func.func @_stats_kernel(%arg0: i32, %arg1: memref<256x36xbf16, #tpu.memory_space<vmem>>, %arg2: memref<36x128xbf16, #tpu.memory_space<vmem>>, %arg3: memref<1x128xf32, #tpu.memory_space<vmem>>, %arg4: memref<1x128xf32, #tpu.memory_space<vmem>>, %arg5: memref<1x128xf32, #tpu.memory_space<vmem>>, %arg6: memref<1x128xf32, #tpu.memory_space<vmem>>) attributes {dimension_semantics = [#tpu.dimension_semantics<arbitrary>], iteration_bounds = array<i64: 2>, scalar_prefetch = 0 : i64, scratch_operands = 2 : i64, tpu.core_type = #tpu.core_type<tc>, window_params = [{transform_indices = @transform_0, window_bounds = array<i64: 256, 36>}, {pipeline_mode = #tpu.pipeline_mode<synchronous>, transform_indices = @transform_1, window_bounds = array<i64: 36, 128>}, {pipeline_mode = #tpu.pipeline_mode<synchronous>, transform_indices = @transform_2, window_bounds = array<i64: 1, 128>}, {pipeline_mode = #tpu.pipeline_mode<synchronous>, transform_indices = @transform_3, window_bounds = array<i64: 1, 128>}]} {
    %c0_i32 = arith.constant 0 : i32
    %0 = arith.cmpi eq, %arg0, %c0_i32 : i32
    %1 = arith.extui %0 : i1 to i32
    %c0_i32_0 = arith.constant 0 : i32
    %2 = arith.cmpi ne, %1, %c0_i32_0 : i32
    scf.if %2 {
      %cst_15 = arith.constant 0.000000e+00 : f32
      %20 = vector.broadcast %cst_15 : f32 to vector<1x128xf32>
      %c0_16 = arith.constant 0 : index
      %c0_17 = arith.constant 0 : index
      %21 = vector.load %arg5[%c0_16, %c0_17] : memref<1x128xf32, #tpu.memory_space<vmem>>, vector<1x128xf32>
      tpu.vector_store %arg5[%c0_16, %c0_17], %20 {strides = array<i32>} : memref<1x128xf32, #tpu.memory_space<vmem>>, vector<1x128xf32>,
      %cst_18 = arith.constant 0.000000e+00 : f32
      %22 = vector.broadcast %cst_18 : f32 to vector<1x128xf32>
      %c0_19 = arith.constant 0 : index
      %c0_20 = arith.constant 0 : index
      %23 = vector.load %arg6[%c0_19, %c0_20] : memref<1x128xf32, #tpu.memory_space<vmem>>, vector<1x128xf32>
      tpu.vector_store %arg6[%c0_19, %c0_20], %22 {strides = array<i32>} : memref<1x128xf32, #tpu.memory_space<vmem>>, vector<1x128xf32>,
    } else {
    }
    %c0 = arith.constant 0 : index
    %c0_1 = arith.constant 0 : index
    %3 = vector.load %arg1[%c0, %c0_1] : memref<256x36xbf16, #tpu.memory_space<vmem>>, vector<256x36xbf16>
    %c0_2 = arith.constant 0 : index
    %c0_3 = arith.constant 0 : index
    %4 = vector.load %arg2[%c0_2, %c0_3] : memref<36x128xbf16, #tpu.memory_space<vmem>>, vector<36x128xbf16>
    %cst = arith.constant dense<0.000000e+00> : vector<256x128xf32>
    %5 = tpu.matmul %3, %4, %cst {dimension_numbers = #tpu.dot_dimension_numbers<[1], [0], [0], [1], [0, 0, 1, 1], [], []>} : vector<256x36xbf16>, vector<36x128xbf16>, vector<256x128xf32> -> vector<256x128xf32>
    %c0_4 = arith.constant 0 : index
    %c0_5 = arith.constant 0 : index
    %6 = vector.load %arg5[%c0_4, %c0_5] : memref<1x128xf32, #tpu.memory_space<vmem>>, vector<1x128xf32>
    %cst_6 = arith.constant dense<0.000000e+00> : vector<128xf32>
    %7 = vector.multi_reduction <add>, %5, %cst_6 [0] : vector<256x128xf32> to vector<128xf32>
    %8 = vector.shape_cast %7 : vector<128xf32> to vector<1x128xf32>
    %9 = arith.addf %6, %8 : vector<1x128xf32>
    %c0_7 = arith.constant 0 : index
    %c0_8 = arith.constant 0 : index
    %10 = vector.load %arg5[%c0_7, %c0_8] : memref<1x128xf32, #tpu.memory_space<vmem>>, vector<1x128xf32>
    tpu.vector_store %arg5[%c0_7, %c0_8], %9 {strides = array<i32>} : memref<1x128xf32, #tpu.memory_space<vmem>>, vector<1x128xf32>,
    %c0_9 = arith.constant 0 : index
    %c0_10 = arith.constant 0 : index
    %11 = vector.load %arg6[%c0_9, %c0_10] : memref<1x128xf32, #tpu.memory_space<vmem>>, vector<1x128xf32>
    %12 = arith.mulf %5, %5 : vector<256x128xf32>
    %cst_11 = arith.constant dense<0.000000e+00> : vector<128xf32>
    %13 = vector.multi_reduction <add>, %12, %cst_11 [0] : vector<256x128xf32> to vector<128xf32>
    %14 = vector.shape_cast %13 : vector<128xf32> to vector<1x128xf32>
    %15 = arith.addf %11, %14 : vector<1x128xf32>
    %c0_12 = arith.constant 0 : index
    %c0_13 = arith.constant 0 : index
    %16 = vector.load %arg6[%c0_12, %c0_13] : memref<1x128xf32, #tpu.memory_space<vmem>>, vector<1x128xf32>
    tpu.vector_store %arg6[%c0_12, %c0_13], %15 {strides = array<i32>} : memref<1x128xf32, #tpu.memory_space<vmem>>, vector<1x128xf32>,
    %c1_i32 = arith.constant 1 : i32
    %17 = arith.cmpi eq, %arg0, %c1_i32 : i32
    %18 = arith.extui %17 : i1 to i32
    %c0_i32_14 = arith.constant 0 : i32
    %19 = arith.cmpi ne, %18, %c0_i32_14 : i32
    scf.if %19 {
      %c0_15 = arith.constant 0 : index
      %c0_16 = arith.constant 0 : index
      %20 = vector.load %arg5[%c0_15, %c0_16] : memref<1x128xf32, #tpu.memory_space<vmem>>, vector<1x128xf32>
      %c0_17 = arith.constant 0 : index
      %c0_18 = arith.constant 0 : index
      %21 = vector.load %arg3[%c0_17, %c0_18] : memref<1x128xf32, #tpu.memory_space<vmem>>, vector<1x128xf32>
      tpu.vector_store %arg3[%c0_17, %c0_18], %20 {strides = array<i32>} : memref<1x128xf32, #tpu.memory_space<vmem>>, vector<1x128xf32>,
      %c0_19 = arith.constant 0 : index
      %c0_20 = arith.constant 0 : index
      %22 = vector.load %arg6[%c0_19, %c0_20] : memref<1x128xf32, #tpu.memory_space<vmem>>, vector<1x128xf32>
      %c0_21 = arith.constant 0 : index
      %c0_22 = arith.constant 0 : index
      %23 = vector.load %arg4[%c0_21, %c0_22] : memref<1x128xf32, #tpu.memory_space<vmem>>, vector<1x128xf32>
      tpu.vector_store %arg4[%c0_21, %c0_22], %22 {strides = array<i32>} : memref<1x128xf32, #tpu.memory_space<vmem>>, vector<1x128xf32>,
    } else {
    }
    return
  }
  func.func @transform_0(%arg0: i32) -> (i32, i32) {
    %c0_i32 = arith.constant 0 : i32
    %c0_i32_0 = arith.constant 0 : i32
    return %arg0, %c0_i32 : i32, i32
  }
  func.func @transform_1(%arg0: i32) -> (i32, i32) {
    %c0_i32 = arith.constant 0 : i32
    %c0_i32_0 = arith.constant 0 : i32
    %c0_i32_1 = arith.constant 0 : i32
    return %c0_i32, %c0_i32_0 : i32, i32
  }
  func.func @transform_2(%arg0: i32) -> (i32, i32) {
    %c0_i32 = arith.constant 0 : i32
    %c0_i32_0 = arith.constant 0 : i32
    %c0_i32_1 = arith.constant 0 : i32
    return %c0_i32, %c0_i32_0 : i32, i32
  }
  func.func @transform_3(%arg0: i32) -> (i32, i32) {
    %c0_i32 = arith.constant 0 : i32
    %c0_i32_0 = arith.constant 0 : i32
    %c0_i32_1 = arith.constant 0 : i32
    return %c0_i32, %c0_i32_0 : i32, i32
  }
}

module attributes {stable_mosaic.version = 11 : i64} {
  func.func @_normalize_kernel(%arg0: i32, %arg1: memref<256x36xbf16, #tpu.memory_space<vmem>>, %arg2: memref<36x128xbf16, #tpu.memory_space<vmem>>, %arg3: memref<1x128xf32, #tpu.memory_space<vmem>>, %arg4: memref<1x128xf32, #tpu.memory_space<vmem>>, %arg5: memref<256x128xf32, #tpu.memory_space<vmem>>) attributes {dimension_semantics = [#tpu.dimension_semantics<parallel>], iteration_bounds = array<i64: 2>, scalar_prefetch = 0 : i64, scratch_operands = 0 : i64, tpu.core_type = #tpu.core_type<tc>, window_params = [{transform_indices = @transform_0, window_bounds = array<i64: 256, 36>}, {pipeline_mode = #tpu.pipeline_mode<synchronous>, transform_indices = @transform_1, window_bounds = array<i64: 36, 128>}, {pipeline_mode = #tpu.pipeline_mode<synchronous>, transform_indices = @transform_2, window_bounds = array<i64: 1, 128>}, {pipeline_mode = #tpu.pipeline_mode<synchronous>, transform_indices = @transform_3, window_bounds = array<i64: 1, 128>}, {transform_indices = @transform_4, window_bounds = array<i64: 256, 128>}]} {
    %c0 = arith.constant 0 : index
    %c0_0 = arith.constant 0 : index
    %0 = vector.load %arg1[%c0, %c0_0] : memref<256x36xbf16, #tpu.memory_space<vmem>>, vector<256x36xbf16>
    %c0_1 = arith.constant 0 : index
    %c0_2 = arith.constant 0 : index
    %1 = vector.load %arg2[%c0_1, %c0_2] : memref<36x128xbf16, #tpu.memory_space<vmem>>, vector<36x128xbf16>
    %cst = arith.constant dense<0.000000e+00> : vector<256x128xf32>
    %2 = tpu.matmul %0, %1, %cst {dimension_numbers = #tpu.dot_dimension_numbers<[1], [0], [0], [1], [0, 0, 1, 1], [], []>} : vector<256x36xbf16>, vector<36x128xbf16>, vector<256x128xf32> -> vector<256x128xf32>
    %c0_3 = arith.constant 0 : index
    %c0_4 = arith.constant 0 : index
    %3 = vector.load %arg3[%c0_3, %c0_4] : memref<1x128xf32, #tpu.memory_space<vmem>>, vector<1x128xf32>
    %4 = vector.broadcast %3 : vector<1x128xf32> to vector<256x128xf32>
    %5 = arith.mulf %2, %4 : vector<256x128xf32>
    %c0_5 = arith.constant 0 : index
    %c0_6 = arith.constant 0 : index
    %6 = vector.load %arg4[%c0_5, %c0_6] : memref<1x128xf32, #tpu.memory_space<vmem>>, vector<1x128xf32>
    %7 = vector.broadcast %6 : vector<1x128xf32> to vector<256x128xf32>
    %8 = arith.addf %5, %7 : vector<256x128xf32>
    %cst_7 = arith.constant 0.000000e+00 : f32
    %9 = vector.broadcast %cst_7 : f32 to vector<256x128xf32>
    %10 = arith.maximumf %8, %9 : vector<256x128xf32>
    %c0_8 = arith.constant 0 : index
    %c0_9 = arith.constant 0 : index
    %11 = vector.load %arg5[%c0_8, %c0_9] : memref<256x128xf32, #tpu.memory_space<vmem>>, vector<256x128xf32>
    tpu.vector_store %arg5[%c0_8, %c0_9], %10 {strides = array<i32>} : memref<256x128xf32, #tpu.memory_space<vmem>>, vector<256x128xf32>,
    return
  }
  func.func @transform_0(%arg0: i32) -> (i32, i32) {
    %c0_i32 = arith.constant 0 : i32
    %c0_i32_0 = arith.constant 0 : i32
    return %arg0, %c0_i32 : i32, i32
  }
  func.func @transform_1(%arg0: i32) -> (i32, i32) {
    %c0_i32 = arith.constant 0 : i32
    %c0_i32_0 = arith.constant 0 : i32
    %c0_i32_1 = arith.constant 0 : i32
    return %c0_i32, %c0_i32_0 : i32, i32
  }
  func.func @transform_2(%arg0: i32) -> (i32, i32) {
    %c0_i32 = arith.constant 0 : i32
    %c0_i32_0 = arith.constant 0 : i32
    %c0_i32_1 = arith.constant 0 : i32
    return %c0_i32, %c0_i32_0 : i32, i32
  }
  func.func @transform_3(%arg0: i32) -> (i32, i32) {
    %c0_i32 = arith.constant 0 : i32
    %c0_i32_0 = arith.constant 0 : i32
    %c0_i32_1 = arith.constant 0 : i32
    return %c0_i32, %c0_i32_0 : i32, i32
  }
  func.func @transform_4(%arg0: i32) -> (i32, i32) {
    %c0_i32 = arith.constant 0 : i32
    %c0_i32_0 = arith.constant 0 : i32
    return %arg0, %c0_i32 : i32, i32
  }
}

</mosaic_0001>

<bundles_post_ra>
// kernel: conv_layer_forward.2
= control target key start
LH: loop header
LB: loop body
LE: loop exit
PB: predicated region body
PF: predicated region fallthrough
CT: control target
= control target key end

     0   :  { %s830_s12 = smov 0   ;;  %s948_s0 = inlined_call_operand.vmem [shape: bf16[512,36], index: 0, kind: input, shape index: {}]   ;;  %s949_s1 = inlined_call_operand.vmem [shape: bf16[36,128], index: 1, kind: input, shape index: {}]   ;;  %s950_s2 = inlined_call_operand.vmem [shape: f32[1,128], index: 2, kind: output, shape index: {0}]   ;;  %s951_s3 = inlined_call_operand.vmem [shape: f32[1,128], index: 3, kind: output, shape index: {1}]  }
   0x1 LB: > { %s836_s13 = sadd.s32 4294967295, %s807_s12   ;;  %p666_p0 = scmp.ge.s32.totalorder %s807_s12, 1  ;;  %s807_s12 = sphi %s830_s12, %s14_s12  }
   0x2   : > { %p131_p1 = scmp.lt.s32.totalorder %s807_s12, 3 }
   0x4   : > { %p132_p2 = pnand %p666_p0, %p131_p1 }
   0x5   : > { %s667_s14 = sshll.u32 (!%p132_p2), %s836_s13, 5  ;;  %p669_p4 = scmp.ne.s32.totalorder (!%p132_p2), %s836_s13, 0 }
   0x6   : > { %135 = sbr.rel (%p132_p2) target bundleno = 335 (0x14f), region = 28  ;;  %p151_p3 = scmp.lt.s32.totalorder (!%p132_p2), %s667_s14, 63 }
   0xd   : > { %s953_s14 = smov (!%p151_p3, %s667_s14), 63  ;;  %160 = sbr.rel (%p669_p4) target bundleno = 20 (0x14), region = 32 }
   0xe   : > { %s668_s15 = sshll.u32 %s953_s14, 2  ;;  %v809_v0 = vmov (!%p669_p4), 0.0  }
   0xf   : > { %s844_s18 = scalar_lea.vmem %s948_s0, %s668_s15  ;;  %161 = vst [vmem:[#allocation2] sm:$0x1] (!%p669_p4), %v809_v0  ;;  %162 = vst [vmem:[#allocation3] sm:$0x1] (!%p669_p4), %v809_v0 }
  0x14 PF: > { %v782_v1 = vld [vmem:[%s949_s1] sm:$0xff]   ;;  %v783_v2 = vld [vmem:[%s949_s1 + $0x8] sm:$0xff]   ;;  %vm295_vm0 = vcmask 293888   ;;  %v784_v3 = vld [vmem:[%s949_s1 + $0x10] ss:$0 sps:$4 sm:$0x33]  }
  0x15   : > { %727 = vmatprep.subr.bf16.mxu0 %v782_v1  ;;  %v785_v4 = vld [vmem:[%s844_s18] sm:$0xff]   ;;  %765 = vmatprep.subr.bf16.mxu1 %v782_v1  ;;  %vm344_vm1 = vcmask 1041408   ;;  %v786_v6 = vld [vmem:[%s844_s18 + $0x8] sm:$0xff]   ;;  %v787_v7 = vld [vmem:[%s844_s18 + $0x10] sm:$0xff]   ;;  %p705_p5 = scmp.ne.s32.totalorder %s836_s13, 1 }
  0x16   : > { %728 = vmatpush3.bf16.msra.mxu0 %v782_v1  ;;  %768 = vmatpush3.bf16.msra.mxu1 %v782_v1  ;;  %v346_v5 = vsel %vm344_vm1, %v784_v3, 0  ;;  %v793_v8 = vld [vmem:[%s844_s18 + $0x40] sm:$0xff]   ;;  %v794_v9 = vld [vmem:[%s844_s18 + $0x48] sm:$0xff]   ;;  %v795_v10 = vld [vmem:[%s844_s18 + $0x50] sm:$0xff]  }
  0x17   : > { %729 = vmatprep.subr.bf16.mxu0 %v783_v2  ;;  %733 = vmatprep.mubr.msk.bf16.mxu0 %vm295_vm0, %v785_v4  ;;  %v788_v11 = vld [vmem:[%s844_s18 + $0x18] sm:$0xff]   ;;  %v789_v13 = vld [vmem:[%s844_s18 + $0x20] sm:$0xff]   ;;  %v790_v15 = vld [vmem:[%s844_s18 + $0x28] sm:$0xff]  }
  0x18   : > { %766 = vmatprep.subr.bf16.mxu1 %v783_v2  ;;  %749 = vmatprep.mubr.msk.bf16.mxu1 %vm295_vm0, %v793_v8  ;;  %v796_v12 = vld [vmem:[%s844_s18 + $0x58] sm:$0xff]   ;;  %v797_v14 = vld [vmem:[%s844_s18 + $0x60] sm:$0xff]   ;;  %v798_v16 = vld [vmem:[%s844_s18 + $0x68] sm:$0xff]  }
  0x19   : > { %v791_v17 = vld [vmem:[%s844_s18 + $0x30] sm:$0xff]   ;;  %v792_v19 = vld [vmem:[%s844_s18 + $0x38] sm:$0xff]  }
  0x1a   : > { %730 = vmatpush3.bf16.msra.mxu0 %v783_v2  ;;  %769 = vmatpush3.bf16.msra.mxu1 %v783_v2  ;;  %v799_v18 = vld [vmem:[%s844_s18 + $0x70] sm:$0xff]   ;;  %v800_v20 = vld [vmem:[%s844_s18 + $0x78] sm:$0xff]  }
  0x1b   : > { %771 = vmatprep.subr.msk.bf16.mxu0 %vm344_vm1, %v784_v3  ;;  %772 = vmatprep.subr.msk.bf16.mxu1 %vm344_vm1, %v784_v3 }
  0x1e   : > { %732 = vmatpush3.bf16.msra.mxu0 %v346_v5  ;;  %770 = vmatpush3.bf16.msra.mxu1 %v346_v5 }
  0x21   : > { %734 = vmatmul.mubr.msk.bf16.vlgmr.msra.gmra.mrb[0].mxu0 %vm295_vm0, %v786_v6  ;;  %750 = vmatmul.mubr.msk.bf16.vlgmr.msra.gmra.mrb[0].mxu1 %vm295_vm0, %v794_v9 }
  0x22   : > { %737 = vmatprep.mubr.msk.bf16.mxu0 %vm295_vm0, %v787_v7  ;;  %753 = vmatprep.mubr.msk.bf16.mxu1 %vm295_vm0, %v795_v10 }
  0x29   : > { %738 = vmatmul.mubr.msk.bf16.gmra.mrb[4].mxu0 %vm295_vm0, %v788_v11  ;;  %754 = vmatmul.mubr.msk.bf16.gmra.mrb[4].mxu1 %vm295_vm0, %v796_v12 }
  0x2a   : > { %741 = vmatprep.mubr.msk.bf16.mxu0 %vm295_vm0, %v789_v13  ;;  %757 = vmatprep.mubr.msk.bf16.mxu1 %vm295_vm0, %v797_v14 }
  0x31   : > { %742 = vmatmul.mubr.msk.bf16.gmra.mrb[8].mxu0 %vm295_vm0, %v790_v15  ;;  %758 = vmatmul.mubr.msk.bf16.gmra.mrb[8].mxu1 %vm295_vm0, %v798_v16 }
  0x32   : > { %745 = vmatprep.mubr.msk.bf16.mxu0 %vm295_vm0, %v791_v17  ;;  %761 = vmatprep.mubr.msk.bf16.mxu1 %vm295_vm0, %v799_v18 }
  0x39   : > { %746 = vmatmul.mubr.msk.bf16.gmra.mrb[12].mxu0 %vm295_vm0, %v792_v19  ;;  %762 = vmatmul.mubr.msk.bf16.gmra.mrb[12].mxu1 %vm295_vm0, %v800_v20 }
  0xf4   : > { %v735_v21 = vpop.f32.mrb[0].mxu0  ;;  %v888_v22 = vpop.f32.mrb[0].mxu1 }
  0xf5   : > { %v382_v23 = vpop.f32.mrb[1].mxu0  ;;  %v890_v24 = vpop.f32.mrb[1].mxu1  ;;  %v552_v32 = vmul.f32 %v735_v21, %v735_v21 }
  0xf6   : > { %v736_v25 = vpop.f32.mrb[2].mxu0  ;;  %v892_v26 = vpop.f32.mrb[2].mxu1  ;;  %v550_v29 = vmul.f32 %v382_v23, %v382_v23 }
  0xf7   : > { %v385_v27 = vpop.f32.mrb[3].mxu0  ;;  %v894_v28 = vpop.f32.mrb[3].mxu1  ;;  %v553_v35 = vmul.f32 %v736_v25, %v736_v25 }
  0xf8   : > { %v510_v30 = vadd.f32 %v385_v27, %v382_v23  ;;  %v551_v31 = vmul.f32 %v385_v27, %v385_v27 }
  0xfa   : > { %v511_v33 = vadd.f32 %v735_v21, %v510_v30  ;;  %v582_v34 = vadd.f32 %v551_v31, %v550_v29 }
  0xfc   : > { %v583_v36 = vadd.f32 %v582_v34, %v552_v32  ;;  %v739_v37 = vpop.f32.mrb[4].mxu0  ;;  %v512_v38 = vadd.f32 %v736_v25, %v511_v33  ;;  %v896_v39 = vpop.f32.mrb[4].mxu1 }
  0xfd   : > { %v398_v40 = vpop.f32.mrb[5].mxu0  ;;  %v898_v41 = vpop.f32.mrb[5].mxu1  ;;  %v556_v52 = vmul.f32 %v739_v37, %v739_v37 }
  0xfe   : > { %v513_v42 = vadd.f32 %v512_v38, %v398_v40  ;;  %v554_v43 = vmul.f32 %v398_v40, %v398_v40  ;;  %v584_v44 = vadd.f32 %v583_v36, %v553_v35  ;;  %v740_v45 = vpop.f32.mrb[6].mxu0  ;;  %v900_v46 = vpop.f32.mrb[6].mxu1  ;;  %v566_v38 = vmul.f32 %v890_v24, %v890_v24 }
  0xff   : > { %v401_v47 = vpop.f32.mrb[7].mxu0  ;;  %v902_v48 = vpop.f32.mrb[7].mxu1  ;;  %v557_v55 = vmul.f32 %v740_v45, %v740_v45 }
 0x100   : > { %v585_v49 = vadd.f32 %v584_v44, %v554_v43  ;;  %v514_v50 = vadd.f32 %v513_v42, %v401_v47  ;;  %v555_v51 = vmul.f32 %v401_v47, %v401_v47  ;;  %v568_v47 = vmul.f32 %v888_v22, %v888_v22 }
 0x102   : > { %v515_v53 = vadd.f32 %v739_v37, %v514_v50  ;;  %v586_v54 = vadd.f32 %v585_v49, %v555_v51  ;;  %v569_v51 = vmul.f32 %v892_v26, %v892_v26 }
 0x104   : > { %v587_v56 = vadd.f32 %v586_v54, %v556_v52  ;;  %v743_v57 = vpop.f32.mrb[8].mxu0  ;;  %v516_v58 = vadd.f32 %v740_v45, %v515_v53  ;;  %v904_v59 = vpop.f32.mrb[8].mxu1  ;;  %v567_v45 = vmul.f32 %v894_v28, %v894_v28 }
 0x105   : > { %v414_v60 = vpop.f32.mrb[9].mxu0  ;;  %v478_v61 = vpop.f32.mrb[9].mxu1  ;;  %v560_v8 = vmul.f32 %v743_v57, %v743_v57 }
 0x106   : > { %v517_v62 = vadd.f32 %v516_v58, %v414_v60  ;;  %v558_v63 = vmul.f32 %v414_v60, %v414_v60  ;;  %v588_v0 = vadd.f32 %v587_v56, %v557_v55  ;;  %v744_v1 = vpop.f32.mrb[10].mxu0  ;;  %v906_v2 = vpop.f32.mrb[10].mxu1 }
 0x107   : > { %v417_v3 = vpop.f32.mrb[11].mxu0  ;;  %v481_v4 = vpop.f32.mrb[11].mxu1  ;;  %v561_v11 = vmul.f32 %v744_v1, %v744_v1 }
 0x108   : > { %v589_v5 = vadd.f32 %v588_v0, %v558_v63  ;;  %v518_v6 = vadd.f32 %v517_v62, %v417_v3  ;;  %v559_v7 = vmul.f32 %v417_v3, %v417_v3 }
 0x10a   : > { %v519_v9 = vadd.f32 %v743_v57, %v518_v6  ;;  %v590_v10 = vadd.f32 %v589_v5, %v559_v7  ;;  %v571_v57 = vmul.f32 %v902_v48, %v902_v48  ;;  %v575_v6 = vmul.f32 %v481_v4, %v481_v4 }
 0x10c   : > { %v591_v12 = vadd.f32 %v590_v10, %v560_v8  ;;  %v747_v13 = vpop.f32.mrb[12].mxu0  ;;  %v520_v14 = vadd.f32 %v744_v1, %v519_v9  ;;  %v763_v15 = vpop.f32.mrb[12].mxu1 }
 0x10d   : > { %v430_v16 = vpop.f32.mrb[13].mxu0  ;;  %v494_v17 = vpop.f32.mrb[13].mxu1  ;;  %v564_v32 = vmul.f32 %v747_v13, %v747_v13 }
 0x10e   : > { %v521_v18 = vadd.f32 %v520_v14, %v430_v16  ;;  %v562_v19 = vmul.f32 %v430_v16, %v430_v16  ;;  %v592_v20 = vadd.f32 %v591_v12, %v561_v11  ;;  %v748_v21 = vpop.f32.mrb[14].mxu0  ;;  %v764_v23 = vpop.f32.mrb[14].mxu1  ;;  %v578_v11 = vmul.f32 %v494_v17, %v494_v17 }
 0x10f   : > { %v433_v25 = vpop.f32.mrb[15].mxu0  ;;  %v497_v27 = vpop.f32.mrb[15].mxu1  ;;  %v565_v35 = vmul.f32 %v748_v21, %v748_v21  ;;  %v580_v16 = vmul.f32 %v763_v15, %v763_v15 }
 0x110   : > { %v593_v29 = vadd.f32 %v592_v20, %v562_v19  ;;  %v522_v30 = vadd.f32 %v521_v18, %v433_v25  ;;  %v563_v31 = vmul.f32 %v433_v25, %v433_v25  ;;  %v579_v14 = vmul.f32 %v497_v27, %v497_v27 }
 0x111   : > { %v581_v19 = vmul.f32 %v764_v23, %v764_v23 }
 0x112   : > { %v523_v33 = vadd.f32 %v747_v13, %v522_v30  ;;  %v594_v34 = vadd.f32 %v593_v29, %v563_v31 }
 0x114   : > { %v595_v36 = vadd.f32 %v594_v34, %v564_v32  ;;  %v524_v37 = vadd.f32 %v748_v21, %v523_v33 }
 0x116   : > { %v525_v40 = vadd.f32 %v524_v37, %v890_v24  ;;  %v596_v42 = vadd.f32 %v595_v36, %v565_v35  ;;  %v570_v24 = vmul.f32 %v898_v41, %v898_v41  ;;  %v509_v35 = vld [vmem:[#allocation2] sm:$0x1] }
 0x118   : > { %v597_v43 = vadd.f32 %v596_v42, %v566_v38  ;;  %v526_v44 = vadd.f32 %v525_v40, %v894_v28 }
 0x11a   : > { %v527_v49 = vadd.f32 %v888_v22, %v526_v44  ;;  %v598_v50 = vadd.f32 %v597_v43, %v567_v45  ;;  %v572_v22 = vmul.f32 %v896_v39, %v896_v39 }
 0x11c   : > { %v599_v52 = vadd.f32 %v598_v50, %v568_v47  ;;  %v528_v53 = vadd.f32 %v892_v26, %v527_v49  ;;  %v573_v26 = vmul.f32 %v900_v46, %v900_v46 }
 0x11e   : > { %v529_v54 = vadd.f32 %v528_v53, %v898_v41  ;;  %v600_v55 = vadd.f32 %v599_v52, %v569_v51  ;;  %v574_v41 = vmul.f32 %v478_v61, %v478_v61 }
 0x120   : > { %v601_v56 = vadd.f32 %v600_v55, %v570_v24  ;;  %v530_v28 = vadd.f32 %v529_v54, %v902_v48  ;;  %v576_v48 = vmul.f32 %v904_v59, %v904_v59 }
 0x122   : > { %v531_v58 = vadd.f32 %v896_v39, %v530_v28  ;;  %v602_v60 = vadd.f32 %v601_v56, %v571_v57  ;;  %v577_v39 = vmul.f32 %v906_v2, %v906_v2 }
 0x124   : > { %v603_v62 = vadd.f32 %v602_v60, %v572_v22  ;;  %v532_v63 = vadd.f32 %v900_v46, %v531_v58 }
 0x126   : > { %v533_v0 = vadd.f32 %v532_v63, %v478_v61  ;;  %v604_v1 = vadd.f32 %v603_v62, %v573_v26 }
 0x128   : > { %v605_v3 = vadd.f32 %v604_v1, %v574_v41  ;;  %v534_v5 = vadd.f32 %v533_v0, %v481_v4 }
 0x12a   : > { %v535_v7 = vadd.f32 %v904_v59, %v534_v5  ;;  %v606_v8 = vadd.f32 %v605_v3, %v575_v6 }
 0x12c   : > { %v607_v9 = vadd.f32 %v606_v8, %v576_v48  ;;  %v536_v10 = vadd.f32 %v906_v2, %v535_v7 }
 0x12e   : > { %v537_v46 = vadd.f32 %v536_v10, %v494_v17  ;;  %v608_v12 = vadd.f32 %v607_v9, %v577_v39 }
 0x130   : > { %v609_v61 = vadd.f32 %v608_v12, %v578_v11  ;;  %v538_v13 = vadd.f32 %v537_v46, %v497_v27  ;;  %v549_v27 = vld [vmem:[#allocation3] sm:$0x1] }
 0x132   : > { %v539_v4 = vadd.f32 %v763_v15, %v538_v13  ;;  %v610_v18 = vadd.f32 %v609_v61, %v579_v14 }
 0x134   : > { %v540_v20 = vadd.f32 %v764_v23, %v539_v4  ;;  %v611_v21 = vadd.f32 %v610_v18, %v580_v16 }
 0x136   : > { %v541_v59 = vrot.slane %v540_v20, 4  ;;  %v612_v25 = vadd.f32 %v611_v21, %v581_v19 }
 0x138   : > { %v542_v29 = vadd.f32 %v541_v59, %v540_v20  ;;  %v613_v30 = vrot.slane %v612_v25, 4 }
 0x13a   : > { %v543_v31 = vrot.slane %v542_v29, 2  ;;  %v614_v32 = vadd.f32 %v613_v30, %v612_v25 }
 0x13c   : > { %v544_v33 = vadd.f32 %v543_v31, %v542_v29  ;;  %v615_v2 = vrot.slane %v614_v32, 2 }
 0x13e   : > { %v545_v34 = vrot.slane %v544_v33, 1  ;;  %v616_v17 = vadd.f32 %v615_v2, %v614_v32 }
 0x140   : > { %v546_v36 = vadd.f32 %v545_v34, %v544_v33  ;;  %v617_v37 = vrot.slane %v616_v17, 1  ;;  %624 = sbr.rel (%p705_p5) target bundleno = 335 (0x14f), region = 36 }
 0x142   : > { %v547_v38 = vadd.f32 %v546_v36, %v509_v35  ;;  %v618_v15 = vadd.f32 %v617_v37, %v616_v17 }
 0x144   : > { %548 = vst [vmem:[#allocation2] sm:$0x1] %v547_v38  ;;  %v619_v40 = vadd.f32 %v618_v15, %v549_v27 }
 0x146   : > { %620 = vst [vmem:[#allocation3] sm:$0x1] %v619_v40 }
 0x14b   : > { %v625_v23 = vld [vmem:[#allocation2] sm:$0x1] }
 0x14c   : > { %626 = vst [vmem:[%s950_s2] sm:$0x1] %v625_v23 }
 0x14d   : > { %v627_v42 = vld [vmem:[#allocation3] sm:$0x1] }
 0x14e   : > { %628 = vst [vmem:[%s951_s3] sm:$0x1] %v627_v42 }
 0x14f PF: > { %s14_s12 = sadd.s32 1, %s807_s12  }
 0x150   : > { %p11_p6 = scmp.ge.s32.totalorder %s14_s12, 4  }
 0x152   :  { %13 = sbr.rel (!%p11_p6) target bundleno = 1 (0x1), region = 70 }

// kernel: conv_layer_forward.3
= control target key start
LH: loop header
LB: loop body
LE: loop exit
PB: predicated region body
PF: predicated region fallthrough
CT: control target
= control target key end

     0   :  { %s919_s15 = smov 0   ;;  %s1091_s0 = inlined_call_operand.vmem [shape: bf16[512,36], index: 0, kind: input, shape index: {}]   ;;  %s1092_s1 = inlined_call_operand.vmem [shape: bf16[36,128], index: 1, kind: input, shape index: {}]   ;;  %s1093_s2 = inlined_call_operand.vmem [shape: f32[1,128], index: 2, kind: input, shape index: {}]   ;;  %s1094_s3 = inlined_call_operand.vmem [shape: f32[1,128], index: 3, kind: input, shape index: {}]   ;;  %s1095_s4 = inlined_call_operand.vmem [shape: f32[512,128], index: 4, kind: output, shape index: {}]  }
   0x1 LB: > { %s746_s16 = sadd.s32 4294967295, %s892_s15   ;;  %p750_p0 = scmp.ge.s32.totalorder %s892_s15, 1  ;;  %s892_s15 = sphi %s919_s15, %s14_s15  }
   0x2   : > { %p163_p1 = scmp.lt.s32.totalorder %s892_s15, 3 }
   0x4   : > { %p164_p2 = pnand %p750_p0, %p163_p1 }
   0x5   : > { %v867_v0 = vld [vmem:[%s1092_s1] sm:$0xff] (!%p164_p2)   ;;  %v868_v1 = vld [vmem:[%s1092_s1 + $0x8] sm:$0xff] (!%p164_p2)   ;;  %s751_s21 = sshll.u32 (!%p164_p2), %s746_s16, 5  ;;  %v869_v2 = vld [vmem:[%s1092_s1 + $0x10] ss:$0 sps:$4 sm:$0x33] (!%p164_p2)  }
   0x6   : > { %167 = sbr.rel (%p164_p2) target bundleno = 265 (0x109), region = 36  ;;  %813 = vmatprep.subr.bf16.mxu0 (!%p164_p2), %v867_v0  ;;  %851 = vmatprep.subr.bf16.mxu1 (!%p164_p2), %v867_v0  ;;  %p190_p3 = scmp.lt.s32.totalorder (!%p164_p2), %s751_s21, 63  ;;  %vm383_vm0 = vcmask (!%p164_p2), 1041408   ;;  %vm334_vm1 = vcmask (!%p164_p2), 293888   ;;  %v979_v20 = vld [vmem:[%s1093_s2] ss:$0 sm:$0xff] (!%p164_p2) }
   0x7   : > { %814 = vmatpush3.bf16.msra.mxu0 (!%p164_p2), %v867_v0  ;;  %854 = vmatpush3.bf16.msra.mxu1 (!%p164_p2), %v867_v0  ;;  %v385_v3 = vsel (!%p164_p2), %vm383_vm0, %v869_v2, 0  ;;  %v984_v22 = vld [vmem:[%s1094_s3] ss:$0 sm:$0xff] (!%p164_p2) }
   0x8   : > { %815 = vmatprep.subr.bf16.mxu0 (!%p164_p2), %v868_v1  ;;  %852 = vmatprep.subr.bf16.mxu1 (!%p164_p2), %v868_v1 }
   0xb   : > { %816 = vmatpush3.bf16.msra.mxu0 (!%p164_p2), %v868_v1  ;;  %855 = vmatpush3.bf16.msra.mxu1 (!%p164_p2), %v868_v1 }
   0xc   : > { %857 = vmatprep.subr.msk.bf16.mxu0 (!%p164_p2), %vm383_vm0, %v869_v2  ;;  %858 = vmatprep.subr.msk.bf16.mxu1 (!%p164_p2), %vm383_vm0, %v869_v2 }
   0xd   : > { %s1097_s21 = smov (!%p190_p3, %s751_s21), 63 }
   0xe   : > { %s752_s24 = sshll.u32 %s1097_s21, 2  ;;  %s754_s6 = sshll.u32 %s1097_s21, 3 }
   0xf   : > { %s942_s27 = scalar_lea.vmem %s1091_s0, %s752_s24  ;;  %818 = vmatpush3.bf16.msra.mxu0 %v385_v3  ;;  %856 = vmatpush3.bf16.msra.mxu1 %v385_v3  ;;  %s998_s9 = scalar_lea.vmem %s1095_s4, %s754_s6 }
  0x10   : > { %v870_v4 = vld [vmem:[%s942_s27] sm:$0xff]   ;;  %v872_v6 = vld [vmem:[%s942_s27 + $0x8] sm:$0xff]   ;;  %v874_v8 = vld [vmem:[%s942_s27 + $0x10] sm:$0xff]  }
  0x11   : > { %v871_v5 = vld [vmem:[%s942_s27 + $0x40] sm:$0xff]   ;;  %819 = vmatprep.mubr.msk.bf16.mxu0 %vm334_vm1, %v870_v4  ;;  %v873_v7 = vld [vmem:[%s942_s27 + $0x48] sm:$0xff]   ;;  %v875_v9 = vld [vmem:[%s942_s27 + $0x50] sm:$0xff]  }
  0x12   : > { %835 = vmatprep.mubr.msk.bf16.mxu1 %vm334_vm1, %v871_v5  ;;  %820 = vmatmul.mubr.msk.bf16.vlgmr.msra.gmra.mrb[0].mxu0 %vm334_vm1, %v872_v6  ;;  %v876_v10 = vld [vmem:[%s942_s27 + $0x18] sm:$0xff]   ;;  %v878_v12 = vld [vmem:[%s942_s27 + $0x20] sm:$0xff]   ;;  %v880_v14 = vld [vmem:[%s942_s27 + $0x28] sm:$0xff]  }
  0x13   : > { %836 = vmatmul.mubr.msk.bf16.vlgmr.msra.gmra.mrb[0].mxu1 %vm334_vm1, %v873_v7  ;;  %823 = vmatprep.mubr.msk.bf16.mxu0 %vm334_vm1, %v874_v8  ;;  %v877_v11 = vld [vmem:[%s942_s27 + $0x58] sm:$0xff]   ;;  %v879_v13 = vld [vmem:[%s942_s27 + $0x60] sm:$0xff]   ;;  %v881_v15 = vld [vmem:[%s942_s27 + $0x68] sm:$0xff]  }
  0x14   : > { %839 = vmatprep.mubr.msk.bf16.mxu1 %vm334_vm1, %v875_v9  ;;  %v882_v16 = vld [vmem:[%s942_s27 + $0x30] sm:$0xff]   ;;  %v884_v18 = vld [vmem:[%s942_s27 + $0x38] sm:$0xff]  }
  0x15   : > { %v883_v17 = vld [vmem:[%s942_s27 + $0x70] sm:$0xff]   ;;  %v885_v19 = vld [vmem:[%s942_s27 + $0x78] sm:$0xff]  }
  0x1a   : > { %824 = vmatmul.mubr.msk.bf16.gmra.mrb[4].mxu0 %vm334_vm1, %v876_v10 }
  0x1b   : > { %840 = vmatmul.mubr.msk.bf16.gmra.mrb[4].mxu1 %vm334_vm1, %v877_v11  ;;  %827 = vmatprep.mubr.msk.bf16.mxu0 %vm334_vm1, %v878_v12 }
  0x1c   : > { %843 = vmatprep.mubr.msk.bf16.mxu1 %vm334_vm1, %v879_v13 }
  0x22   : > { %828 = vmatmul.mubr.msk.bf16.gmra.mrb[8].mxu0 %vm334_vm1, %v880_v14 }
  0x23   : > { %844 = vmatmul.mubr.msk.bf16.gmra.mrb[8].mxu1 %vm334_vm1, %v881_v15  ;;  %831 = vmatprep.mubr.msk.bf16.mxu0 %vm334_vm1, %v882_v16 }
  0x24   : > { %847 = vmatprep.mubr.msk.bf16.mxu1 %vm334_vm1, %v883_v17 }
  0x2a   : > { %832 = vmatmul.mubr.msk.bf16.gmra.mrb[12].mxu0 %vm334_vm1, %v884_v18 }
  0x2b   : > { %848 = vmatmul.mubr.msk.bf16.gmra.mrb[12].mxu1 %vm334_vm1, %v885_v19 }
  0xe5   : > { %v821_v21 = vpop.f32.mrb[0].mxu0 }
  0xe6   : > { %v837_v23 = vpop.f32.mrb[0].mxu1  ;;  %v557_v24 = vmul.f32 %v821_v21, %v979_v20  ;;  %v421_v26 = vpop.f32.mrb[1].mxu0 }
  0xe7   : > { %v573_v25 = vmul.f32 %v837_v23, %v979_v20  ;;  %v485_v27 = vpop.f32.mrb[1].mxu1  ;;  %v555_v28 = vmul.f32 %v979_v20, %v421_v26  ;;  %v822_v30 = vpop.f32.mrb[2].mxu0 }
  0xe8   : > { %v571_v29 = vmul.f32 %v979_v20, %v485_v27  ;;  %v838_v31 = vpop.f32.mrb[2].mxu1  ;;  %v596_v32 = vadd.f32 %v984_v22, %v557_v24  ;;  %v558_v34 = vmul.f32 %v822_v30, %v979_v20  ;;  %v424_v36 = vpop.f32.mrb[3].mxu0 }
  0xe9   : > { %v612_v33 = vadd.f32 %v984_v22, %v573_v25  ;;  %v574_v35 = vmul.f32 %v838_v31, %v979_v20  ;;  %v488_v37 = vpop.f32.mrb[3].mxu1  ;;  %v594_v38 = vadd.f32 %v984_v22, %v555_v28  ;;  %v556_v40 = vmul.f32 %v979_v20, %v424_v36 }
  0xea   : > { %v610_v39 = vadd.f32 %v984_v22, %v571_v29  ;;  %v572_v41 = vmul.f32 %v979_v20, %v488_v37  ;;  %v628_v42 = vmax.f32 %v596_v32, 0.0  ;;  %v597_v44 = vadd.f32 %v984_v22, %v558_v34 }
  0xeb   : > { %v644_v43 = vmax.f32 %v612_v33, 0.0  ;;  %v613_v45 = vadd.f32 %v984_v22, %v574_v35  ;;  %v626_v46 = vmax.f32 %v594_v38, 0.0  ;;  %v595_v48 = vadd.f32 %v984_v22, %v556_v40 }
  0xec   : > { %v642_v47 = vmax.f32 %v610_v39, 0.0  ;;  %v611_v49 = vadd.f32 %v984_v22, %v572_v41  ;;  %660 = vst [vmem:[%s998_s9 + $0x10] sm:$0xff] %v628_v42  ;;  %v629_v50 = vmax.f32 %v597_v44, 0.0 }
  0xed   : > { %676 = vst [vmem:[%s998_s9 + $0x90] sm:$0xff] %v644_v43  ;;  %v645_v51 = vmax.f32 %v613_v45, 0.0  ;;  %658 = vst [vmem:[%s998_s9] sm:$0xff] %v626_v46  ;;  %v627_v52 = vmax.f32 %v595_v48, 0.0  ;;  %v825_v54 = vpop.f32.mrb[4].mxu0 }
  0xee   : > { %674 = vst [vmem:[%s998_s9 + $0x80] sm:$0xff] %v642_v47  ;;  %v643_v53 = vmax.f32 %v611_v49, 0.0  ;;  %v841_v55 = vpop.f32.mrb[4].mxu1  ;;  %661 = vst [vmem:[%s998_s9 + $0x18] sm:$0xff] %v629_v50  ;;  %v561_v56 = vmul.f32 %v825_v54, %v979_v20  ;;  %v437_v58 = vpop.f32.mrb[5].mxu0 }
  0xef   : > { %677 = vst [vmem:[%s998_s9 + $0x98] sm:$0xff] %v645_v51  ;;  %v577_v57 = vmul.f32 %v841_v55, %v979_v20  ;;  %v501_v59 = vpop.f32.mrb[5].mxu1  ;;  %659 = vst [vmem:[%s998_s9 + $0x8] sm:$0xff] %v627_v52  ;;  %v559_v60 = vmul.f32 %v979_v20, %v437_v58  ;;  %v826_v62 = vpop.f32.mrb[6].mxu0 }
  0xf0   : > { %675 = vst [vmem:[%s998_s9 + $0x88] sm:$0xff] %v643_v53  ;;  %v575_v61 = vmul.f32 %v979_v20, %v501_v59  ;;  %v842_v63 = vpop.f32.mrb[6].mxu1  ;;  %v600_v0 = vadd.f32 %v984_v22, %v561_v56  ;;  %v562_v2 = vmul.f32 %v826_v62, %v979_v20  ;;  %v440_v4 = vpop.f32.mrb[7].mxu0 }
  0xf1   : > { %v616_v1 = vadd.f32 %v984_v22, %v577_v57  ;;  %v578_v3 = vmul.f32 %v842_v63, %v979_v20  ;;  %v504_v5 = vpop.f32.mrb[7].mxu1  ;;  %v598_v6 = vadd.f32 %v984_v22, %v559_v60  ;;  %v560_v8 = vmul.f32 %v979_v20, %v440_v4 }
  0xf2   : > { %v614_v7 = vadd.f32 %v984_v22, %v575_v61  ;;  %v576_v9 = vmul.f32 %v979_v20, %v504_v5  ;;  %v632_v10 = vmax.f32 %v600_v0, 0.0  ;;  %v601_v12 = vadd.f32 %v984_v22, %v562_v2 }
  0xf3   : > { %v648_v11 = vmax.f32 %v616_v1, 0.0  ;;  %v617_v13 = vadd.f32 %v984_v22, %v578_v3  ;;  %v630_v14 = vmax.f32 %v598_v6, 0.0  ;;  %v599_v16 = vadd.f32 %v984_v22, %v560_v8 }
  0xf4   : > { %v646_v15 = vmax.f32 %v614_v7, 0.0  ;;  %v615_v17 = vadd.f32 %v984_v22, %v576_v9  ;;  %664 = vst [vmem:[%s998_s9 + $0x30] sm:$0xff] %v632_v10  ;;  %v633_v18 = vmax.f32 %v601_v12, 0.0 }
  0xf5   : > { %680 = vst [vmem:[%s998_s9 + $0xb0] sm:$0xff] %v648_v11  ;;  %v649_v19 = vmax.f32 %v617_v13, 0.0  ;;  %662 = vst [vmem:[%s998_s9 + $0x20] sm:$0xff] %v630_v14  ;;  %v631_v21 = vmax.f32 %v599_v16, 0.0  ;;  %v829_v24 = vpop.f32.mrb[8].mxu0 }
  0xf6   : > { %678 = vst [vmem:[%s998_s9 + $0xa0] sm:$0xff] %v646_v15  ;;  %v647_v23 = vmax.f32 %v615_v17, 0.0  ;;  %v845_v25 = vpop.f32.mrb[8].mxu1  ;;  %665 = vst [vmem:[%s998_s9 + $0x38] sm:$0xff] %v633_v18  ;;  %v565_v26 = vmul.f32 %v829_v24, %v979_v20  ;;  %v453_v28 = vpop.f32.mrb[9].mxu0 }
  0xf7   : > { %681 = vst [vmem:[%s998_s9 + $0xb8] sm:$0xff] %v649_v19  ;;  %v581_v27 = vmul.f32 %v845_v25, %v979_v20  ;;  %v517_v29 = vpop.f32.mrb[9].mxu1  ;;  %663 = vst [vmem:[%s998_s9 + $0x28] sm:$0xff] %v631_v21  ;;  %v563_v30 = vmul.f32 %v979_v20, %v453_v28  ;;  %v830_v32 = vpop.f32.mrb[10].mxu0 }
  0xf8   : > { %679 = vst [vmem:[%s998_s9 + $0xa8] sm:$0xff] %v647_v23  ;;  %v579_v31 = vmul.f32 %v979_v20, %v517_v29  ;;  %v846_v33 = vpop.f32.mrb[10].mxu1  ;;  %v604_v34 = vadd.f32 %v984_v22, %v565_v26  ;;  %v566_v36 = vmul.f32 %v830_v32, %v979_v20  ;;  %v456_v38 = vpop.f32.mrb[11].mxu0 }
  0xf9   : > { %v620_v35 = vadd.f32 %v984_v22, %v581_v27  ;;  %v582_v37 = vmul.f32 %v846_v33, %v979_v20  ;;  %v520_v39 = vpop.f32.mrb[11].mxu1  ;;  %v602_v40 = vadd.f32 %v984_v22, %v563_v30  ;;  %v564_v42 = vmul.f32 %v979_v20, %v456_v38 }
  0xfa   : > { %v618_v41 = vadd.f32 %v984_v22, %v579_v31  ;;  %v580_v43 = vmul.f32 %v979_v20, %v520_v39  ;;  %v636_v44 = vmax.f32 %v604_v34, 0.0  ;;  %v605_v46 = vadd.f32 %v984_v22, %v566_v36 }
  0xfb   : > { %v652_v45 = vmax.f32 %v620_v35, 0.0  ;;  %v621_v47 = vadd.f32 %v984_v22, %v582_v37  ;;  %v634_v48 = vmax.f32 %v602_v40, 0.0  ;;  %v603_v50 = vadd.f32 %v984_v22, %v564_v42 }
  0xfc   : > { %v650_v49 = vmax.f32 %v618_v41, 0.0  ;;  %v619_v51 = vadd.f32 %v984_v22, %v580_v43  ;;  %668 = vst [vmem:[%s998_s9 + $0x50] sm:$0xff] %v636_v44  ;;  %v637_v52 = vmax.f32 %v605_v46, 0.0 }
  0xfd   : > { %684 = vst [vmem:[%s998_s9 + $0xd0] sm:$0xff] %v652_v45  ;;  %v653_v53 = vmax.f32 %v621_v47, 0.0  ;;  %666 = vst [vmem:[%s998_s9 + $0x40] sm:$0xff] %v634_v48  ;;  %v635_v54 = vmax.f32 %v603_v50, 0.0  ;;  %v833_v56 = vpop.f32.mrb[12].mxu0 }
  0xfe   : > { %682 = vst [vmem:[%s998_s9 + $0xc0] sm:$0xff] %v650_v49  ;;  %v651_v55 = vmax.f32 %v619_v51, 0.0  ;;  %v849_v57 = vpop.f32.mrb[12].mxu1  ;;  %669 = vst [vmem:[%s998_s9 + $0x58] sm:$0xff] %v637_v52  ;;  %v569_v58 = vmul.f32 %v833_v56, %v979_v20  ;;  %v469_v60 = vpop.f32.mrb[13].mxu0 }
  0xff   : > { %685 = vst [vmem:[%s998_s9 + $0xd8] sm:$0xff] %v653_v53  ;;  %v585_v59 = vmul.f32 %v849_v57, %v979_v20  ;;  %v533_v61 = vpop.f32.mrb[13].mxu1  ;;  %667 = vst [vmem:[%s998_s9 + $0x48] sm:$0xff] %v635_v54  ;;  %v567_v62 = vmul.f32 %v979_v20, %v469_v60  ;;  %v834_v0 = vpop.f32.mrb[14].mxu0 }
 0x100   : > { %683 = vst [vmem:[%s998_s9 + $0xc8] sm:$0xff] %v651_v55  ;;  %v583_v63 = vmul.f32 %v979_v20, %v533_v61  ;;  %v850_v1 = vpop.f32.mrb[14].mxu1  ;;  %v608_v2 = vadd.f32 %v984_v22, %v569_v58  ;;  %v570_v4 = vmul.f32 %v834_v0, %v979_v20  ;;  %v472_v6 = vpop.f32.mrb[15].mxu0 }
 0x101   : > { %v624_v3 = vadd.f32 %v984_v22, %v585_v59  ;;  %v586_v5 = vmul.f32 %v850_v1, %v979_v20  ;;  %v536_v7 = vpop.f32.mrb[15].mxu1  ;;  %v606_v8 = vadd.f32 %v984_v22, %v567_v62  ;;  %v568_v10 = vmul.f32 %v979_v20, %v472_v6 }
 0x102   : > { %v622_v9 = vadd.f32 %v984_v22, %v583_v63  ;;  %v584_v11 = vmul.f32 %v979_v20, %v536_v7  ;;  %v640_v12 = vmax.f32 %v608_v2, 0.0  ;;  %v609_v14 = vadd.f32 %v984_v22, %v570_v4 }
 0x103   : > { %v656_v13 = vmax.f32 %v624_v3, 0.0  ;;  %v625_v15 = vadd.f32 %v984_v22, %v586_v5  ;;  %v638_v16 = vmax.f32 %v606_v8, 0.0  ;;  %v607_v18 = vadd.f32 %v984_v22, %v568_v10 }
 0x104   : > { %v654_v17 = vmax.f32 %v622_v9, 0.0  ;;  %v623_v19 = vadd.f32 %v984_v22, %v584_v11  ;;  %672 = vst [vmem:[%s998_s9 + $0x70] sm:$0xff] %v640_v12  ;;  %v641_v21 = vmax.f32 %v609_v14, 0.0 }
 0x105   : > { %688 = vst [vmem:[%s998_s9 + $0xf0] sm:$0xff] %v656_v13  ;;  %v657_v20 = vmax.f32 %v625_v15, 0.0  ;;  %670 = vst [vmem:[%s998_s9 + $0x60] sm:$0xff] %v638_v16  ;;  %v639_v23 = vmax.f32 %v607_v18, 0.0 }
 0x106   : > { %686 = vst [vmem:[%s998_s9 + $0xe0] sm:$0xff] %v654_v17  ;;  %v655_v24 = vmax.f32 %v623_v19, 0.0  ;;  %673 = vst [vmem:[%s998_s9 + $0x78] sm:$0xff] %v641_v21 }
 0x107   : > { %689 = vst [vmem:[%s998_s9 + $0xf8] sm:$0xff] %v657_v20  ;;  %671 = vst [vmem:[%s998_s9 + $0x68] sm:$0xff] %v639_v23 }
 0x108   : > { %687 = vst [vmem:[%s998_s9 + $0xe8] sm:$0xff] %v655_v24 }
 0x109 PF: > { %s14_s15 = sadd.s32 1, %s892_s15  }
 0x10a   : > { %p11_p4 = scmp.ge.s32.totalorder %s14_s15, 4  }
 0x10c   :  { %13 = sbr.rel (!%p11_p4) target bundleno = 1 (0x1), region = 66 }

</bundles_post_ra>
